<compile_context>
chip_gen: v7x
topology: tpu7x:2x2x1
jax: 0.10.0
libtpu: 0.0.40
codegen_flags: <defaults>
</compile_context>

<pallas_src>
import functools

import jax
import jax.numpy as jnp
from jax.experimental import pallas as pl
from jax.experimental.pallas import tpu as pltpu


def _round_up(x, m):
    return (x + m - 1) // m * m


def _nfl_kernel(pred_ref, labels_ref, out_ref, acc_ref, *,
                scale, gamma, n_valid, size_average):
    pid = pl.program_id(0)

    @pl.when(pid == 0)
    def _init():
        acc_ref[0, 0] = jnp.float32(0.0)

    x = pred_ref[...].astype(jnp.float32)            # (Tn, C)
    tn, c = x.shape
    labels = labels_ref[...]                         # (Tn, 1) int32

    # --- log-softmax over classes (numerically stable) ---
    m = jnp.max(x, axis=1, keepdims=True)
    xm = x - m
    e = jnp.exp(xm)
    sum_e = jnp.sum(e, axis=1, keepdims=True)        # (Tn, 1)
    logpt = xm - jnp.log(sum_e)                      # (Tn, C)

    # --- gather logpt at the target class via a one-hot mask (no TPU gather) ---
    cls = jax.lax.broadcasted_iota(jnp.int32, (tn, c), 1)
    onehot = cls == labels                           # (Tn, C) bool
    logpt_t = jnp.sum(jnp.where(onehot, logpt, 0.0), axis=1, keepdims=True)

    if gamma == 0:
        # (1 - p)^0 == 1 (matches torch 0**0 == 1): no focal weighting needed.
        normalizor = -jnp.sum(logpt, axis=1, keepdims=True)        # (Tn, 1)
        num = -logpt_t
    else:
        p = e / sum_e                                # softmax probs, reuses e
        w = (1.0 - p) ** gamma
        normalizor = -jnp.sum(w * logpt, axis=1, keepdims=True)    # (Tn, 1)
        pt = jnp.exp(logpt_t)
        num = -((1.0 - pt) ** gamma) * logpt_t

    loss = num / normalizor                          # (Tn, 1)

    # Mask rows that only exist to pad the batch to a tile multiple.
    row = pid * tn + jax.lax.broadcasted_iota(jnp.int32, (tn, 1), 0)
    loss = jnp.where(row < n_valid, loss, 0.0)

    acc_ref[0, 0] += jnp.sum(loss)

    @pl.when(pid == pl.num_programs(0) - 1)
    def _finalize():
        denom = jnp.float32(n_valid if size_average else 1)
        out_ref[0, 0] = jnp.float32(scale) * acc_ref[0, 0] / denom


def normalized_focal_loss(pred, target, *, num_classes=None, scale=1.0,
                          gamma=0, size_average=True, block_rows=512):
    """pred: (N, C) logits (f32 or bf16); target: (N,) int class ids -> scalar f32.

    block_rows sizes the row tile: 512 is a good default for v5e/v6e; for very
    wide C on v7x (64 MiB VMEM) pick a smaller value so 2 buffers still fit.
    """
    n, c = pred.shape
    if num_classes is not None:
        assert c == num_classes

    tn = _round_up(min(int(block_rows), _round_up(n, 8)), 8)
    n_pad = _round_up(n, tn)

    labels2d = target.reshape(n, 1).astype(jnp.int32)
    if n_pad != n:
        pred = jnp.pad(pred, ((0, n_pad - n), (0, 0)))      # zero rows, masked in-kernel
        labels2d = jnp.pad(labels2d, ((0, n_pad - n), (0, 0)))

    out = pl.pallas_call(
        functools.partial(
            _nfl_kernel,
            scale=float(scale), gamma=gamma,
            n_valid=n, size_average=bool(size_average)),
        out_shape=jax.ShapeDtypeStruct((1, 1), jnp.float32),
        grid=(n_pad // tn,),
        in_specs=[
            pl.BlockSpec((tn, c), lambda i: (i, 0)),   # logits tile (input dtype)
            pl.BlockSpec((tn, 1), lambda i: (i, 0)),   # label column tile
        ],
        out_specs=pl.BlockSpec(memory_space=pltpu.SMEM),    # scalar result
        scratch_shapes=[pltpu.SMEM((1, 1), jnp.float32)],   # running loss sum
        compiler_params=pltpu.CompilerParams(
            dimension_semantics=("arbitrary",)),             # reduction axis
    )(pred, labels2d)
    return out[0, 0]


def _nfl_reference(pred, target, *, scale=1.0, gamma=0, size_average=True):
    """Pure-JAX mirror of the PyTorch forward (for correctness checking)."""
    logpt = jax.nn.log_softmax(pred.astype(jnp.float32), axis=1)
    normalizor = jnp.sum(-1.0 * (1.0 - jnp.exp(logpt)) ** gamma * logpt, axis=1)
    logpt_t = jnp.take_along_axis(
        logpt, target[:, None].astype(jnp.int32), axis=1)[:, 0]
    pt = jnp.exp(logpt_t)
    loss = -1.0 * (1.0 - pt) ** gamma * logpt_t
    loss = scale * loss / normalizor
    return jnp.mean(loss) if size_average else jnp.sum(loss)


if __name__ == "__main__":
    key = jax.random.PRNGKey(0)
    k1, k2 = jax.random.split(key)

    # Small shapes consistent with the module's forward: (N, num_classes) logits.
    N, C = 20, 10
    pred = jax.random.normal(k1, (N, C), dtype=jnp.float32)
    target = jax.random.randint(k2, (N,), 0, C, dtype=jnp.int32)

    # gamma = 0 (module default); block_rows=8 exercises the grid + masked tail.
    out0 = normalized_focal_loss(pred, target, num_classes=C,
                                 scale=1.0, gamma=0, block_rows=8)
    jax.block_until_ready(out0)
    ref0 = _nfl_reference(pred, target, scale=1.0, gamma=0)
    assert jnp.allclose(out0, ref0, rtol=1e-5, atol=1e-5), (out0, ref0)

    # gamma = 2 exercises the focal-weighted path.
    out2 = normalized_focal_loss(pred, target, num_classes=C,
                                 scale=2.0, gamma=2, block_rows=8)
    jax.block_until_ready(out2)
    ref2 = _nfl_reference(pred, target, scale=2.0, gamma=2)
    assert jnp.allclose(out2, ref2, rtol=1e-5, atol=1e-5), (out2, ref2)

    print("KERNEL_OK")
</pallas_src>

<mosaic_0001>
module attributes {stable_mosaic.version = 11 : i64} {
  func.func @_nfl_kernel(%arg0: i32, %arg1: memref<8x10xf32, #tpu.memory_space<vmem>>, %arg2: memref<8x1xi32, #tpu.memory_space<vmem>>, %arg3: memref<1x1xf32, #tpu.memory_space<smem>>, %arg4: memref<1x1xf32, #tpu.memory_space<smem>>) attributes {dimension_semantics = [#tpu.dimension_semantics<arbitrary>], iteration_bounds = array<i64: 3>, scalar_prefetch = 0 : i64, scratch_operands = 1 : i64, tpu.core_type = #tpu.core_type<tc>, window_params = [{transform_indices = @transform_0, window_bounds = array<i64: 8, 10>}, {transform_indices = @transform_1, window_bounds = array<i64: 8, 1>}, {transform_indices = @transform_2, window_bounds = array<i64: 1, 1>}]} {
    %c0_i32 = arith.constant 0 : i32
    %0 = arith.cmpi eq, %arg0, %c0_i32 : i32
    %1 = arith.extui %0 : i1 to i32
    %c0_i32_0 = arith.constant 0 : i32
    %2 = arith.cmpi ne, %1, %c0_i32_0 : i32
    scf.if %2 {
      %cst_17 = arith.constant 0.000000e+00 : f32
      %c0_18 = arith.constant 0 : index
      %c0_19 = arith.constant 0 : index
      %47 = memref.load %arg4[%c0_18, %c0_19] : memref<1x1xf32, #tpu.memory_space<smem>>
      memref.store %cst_17, %arg4[%c0_18, %c0_19] : memref<1x1xf32, #tpu.memory_space<smem>>
    } else {
    }
    %c0 = arith.constant 0 : index
    %c0_1 = arith.constant 0 : index
    %3 = vector.load %arg1[%c0, %c0_1] : memref<8x10xf32, #tpu.memory_space<vmem>>, vector<8x10xf32>
    %c0_2 = arith.constant 0 : index
    %c0_3 = arith.constant 0 : index
    %4 = vector.load %arg2[%c0_2, %c0_3] : memref<8x1xi32, #tpu.memory_space<vmem>>, vector<8x1xi32>
    %cst = arith.constant dense<0xFF800000> : vector<8xf32>
    %5 = vector.multi_reduction <maximumf>, %3, %cst [1] : vector<8x10xf32> to vector<8xf32>
    %6 = vector.shape_cast %5 : vector<8xf32> to vector<8x1xf32>
    %7 = vector.broadcast %6 : vector<8x1xf32> to vector<8x10xf32>
    %8 = arith.subf %3, %7 : vector<8x10xf32>
    %9 = math.exp %8 : vector<8x10xf32>
    %cst_4 = arith.constant dense<0.000000e+00> : vector<8xf32>
    %10 = vector.multi_reduction <add>, %9, %cst_4 [1] : vector<8x10xf32> to vector<8xf32>
    %11 = vector.shape_cast %10 : vector<8xf32> to vector<8x1xf32>
    %12 = math.log %11 : vector<8x1xf32>
    %13 = vector.broadcast %12 : vector<8x1xf32> to vector<8x10xf32>
    %14 = arith.subf %8, %13 : vector<8x10xf32>
    %15 = tpu.iota {dimensions = array<i32: 1>} : vector<8x10xi32>
    %16 = vector.broadcast %4 : vector<8x1xi32> to vector<8x10xi32>
    %17 = arith.cmpi eq, %15, %16 : vector<8x10xi32>
    %cst_5 = arith.constant 0.000000e+00 : f32
    %18 = vector.broadcast %cst_5 : f32 to vector<8x10xf32>
    %19 = arith.select %17, %14, %18 : vector<8x10xi1>, vector<8x10xf32>
    %cst_6 = arith.constant dense<0.000000e+00> : vector<8xf32>
    %20 = vector.multi_reduction <add>, %19, %cst_6 [1] : vector<8x10xf32> to vector<8xf32>
    %21 = vector.shape_cast %20 : vector<8xf32> to vector<8x1xf32>
    %cst_7 = arith.constant dense<0.000000e+00> : vector<8xf32>
    %22 = vector.multi_reduction <add>, %14, %cst_7 [1] : vector<8x10xf32> to vector<8xf32>
    %23 = vector.shape_cast %22 : vector<8xf32> to vector<8x1xf32>
    %cst_8 = arith.constant 0.000000e+00 : f32
    %24 = vector.broadcast %cst_8 : f32 to vector<8x1xf32>
    %25 = arith.subf %24, %23 : vector<8x1xf32>
    %cst_9 = arith.constant 0.000000e+00 : f32
    %26 = vector.broadcast %cst_9 : f32 to vector<8x1xf32>
    %27 = arith.subf %26, %21 : vector<8x1xf32>
    %28 = arith.divf %27, %25 : vector<8x1xf32>
    %c8_i32 = arith.constant 8 : i32
    %29 = arith.muli %arg0, %c8_i32 : i32
    %30 = tpu.iota {dimensions = array<i32: 0>} : vector<8x1xi32>
    %31 = vector.broadcast %29 : i32 to vector<8x1xi32>
    %32 = arith.addi %31, %30 : vector<8x1xi32>
    %c20_i32 = arith.constant 20 : i32
    %33 = vector.broadcast %c20_i32 : i32 to vector<8x1xi32>
    %34 = arith.cmpi slt, %32, %33 : vector<8x1xi32>
    %cst_10 = arith.constant 0.000000e+00 : f32
    %35 = vector.broadcast %cst_10 : f32 to vector<8x1xf32>
    %36 = arith.select %34, %28, %35 : vector<8x1xi1>, vector<8x1xf32>
    %c0_11 = arith.constant 0 : index
    %c0_12 = arith.constant 0 : index
    %37 = memref.load %arg4[%c0_11, %c0_12] : memref<1x1xf32, #tpu.memory_space<smem>>
    %38 = vector.shape_cast %36 : vector<8x1xf32> to vector<1x8x1xf32>
    %cst_13 = arith.constant dense<0.000000e+00> : vector<1xf32>
    %39 = vector.multi_reduction <add>, %38, %cst_13 [1, 2] : vector<1x8x1xf32> to vector<1xf32>
    %40 = vector.shape_cast %39 : vector<1xf32> to vector<1x1x1xf32>
    %41 = vector.extract %40[0, 0, 0] : f32 from vector<1x1x1xf32>
    %42 = arith.addf %37, %41 : f32
    %c0_14 = arith.constant 0 : index
    %c0_15 = arith.constant 0 : index
    %43 = memref.load %arg4[%c0_14, %c0_15] : memref<1x1xf32, #tpu.memory_space<smem>>
    memref.store %42, %arg4[%c0_14, %c0_15] : memref<1x1xf32, #tpu.memory_space<smem>>
    %c2_i32 = arith.constant 2 : i32
    %44 = arith.cmpi eq, %arg0, %c2_i32 : i32
    %45 = arith.extui %44 : i1 to i32
    %c0_i32_16 = arith.constant 0 : i32
    %46 = arith.cmpi ne, %45, %c0_i32_16 : i32
    scf.if %46 {
      %c0_17 = arith.constant 0 : index
      %c0_18 = arith.constant 0 : index
      %47 = memref.load %arg4[%c0_17, %c0_18] : memref<1x1xf32, #tpu.memory_space<smem>>
      %cst_19 = arith.constant 1.000000e+00 : f32
      %48 = arith.mulf %cst_19, %47 : f32
      %cst_20 = arith.constant 2.000000e+01 : f32
      %49 = arith.divf %48, %cst_20 : f32
      %c0_21 = arith.constant 0 : index
      %c0_22 = arith.constant 0 : index
      %50 = memref.load %arg3[%c0_21, %c0_22] : memref<1x1xf32, #tpu.memory_space<smem>>
      memref.store %49, %arg3[%c0_21, %c0_22] : memref<1x1xf32, #tpu.memory_space<smem>>
    } else {
    }
    return
  }
  func.func @transform_0(%arg0: i32) -> (i32, i32) {
    %c0_i32 = arith.constant 0 : i32
    %c0_i32_0 = arith.constant 0 : i32
    return %arg0, %c0_i32 : i32, i32
  }
  func.func @transform_1(%arg0: i32) -> (i32, i32) {
    %c0_i32 = arith.constant 0 : i32
    %c0_i32_0 = arith.constant 0 : i32
    return %arg0, %c0_i32 : i32, i32
  }
  func.func @transform_2(%arg0: i32) -> (i32, i32) {
    %c0_i32 = arith.constant 0 : i32
    %c0_i32_0 = arith.constant 0 : i32
    %c0_i32_1 = arith.constant 0 : i32
    return %c0_i32, %c0_i32_0 : i32, i32
  }
}

</mosaic_0001>

<bundles_post_ra>
// kernel: tpu_custom_call.1
= control target key start
LH: loop header
LB: loop body
LE: loop exit
PB: predicated region body
PF: predicated region fallthrough
CT: control target
= control target key end

     0   :  { %7 = vsyncpa [#allocation4], 0  ;;  %s359_s9 = smov 0   ;;  %s409_s0 = inlined_call_operand.vmem [shape: f32[24,10], index: 0, kind: input, shape index: {}]   ;;  %s410_s1 = inlined_call_operand.vmem [shape: s32[24,1], index: 1, kind: input, shape index: {}]   ;;  %s411_s2 = inlined_call_operand.hbm [shape: f32[1,1], index: 2, kind: output, shape index: {}]  }
   0x1 LB: > { %s365_s10 = sadd.s32 4294967295, %s339_s9   ;;  %p274_p0 = scmp.ge.s32.totalorder %s339_s9, 1  ;;  %s339_s9 = sphi %s359_s9, %s13_s9  }
   0x2   : > { %p116_p1 = scmp.lt.s32.totalorder %s339_s9, 4 }
   0x4   : > { %p117_p2 = pnand %p274_p0, %p116_p1 }
   0x5   : > { %p136_p3 = scmp.lt.s32.totalorder (!%p117_p2), %s365_s10, 2  ;;  %vm152_vm0 = vcmask (!%p117_p2), 80896   ;;  %v341_v2 = vmov (!%p117_p2), 0   ;;  %v165_v10 = vlaneseq (!%p117_p2)  ;;  %s278_s19 = sshll.u32 (!%p117_p2), %s365_s10, 3  ;;  %vm190_vm3 = vcmask (!%p117_p2), 7168  }
   0x6   : > { %120 = sbr.rel (%p117_p2) target bundleno = 709 (0x2c5), region = 28  ;;  %309 = vset.pattern.permute.xlu1 (!%p117_p2), %v341_v2  ;;  %310 = vset.pattern.permute.xlu0 (!%p117_p2), %v341_v2  ;;  %v185_v22 = vstv (!%p117_p2), %s278_s19  ;;  %p294_p4 = scmp.eq.s32.totalorder (!%p117_p2), %s365_s10, 0 }
   0x7   : > { %v166_v11 = vand.u32 (!%p117_p2), 127, %v165_v10  ;;  %v184_v21 = vshrl.u32 (!%p117_p2), %v165_v10, 7  ;;  %s342_s20 = smov (!%p117_p2), 0.0   ;;  %p295_p5 = scmp.eq.s32.totalorder (!%p117_p2), %s365_s10, 2 }
   0x8   : > { %s317_s27 = scalar_lea.hbm (!%p117_p2), %s411_s2, 16 }
   0x9   : > { %v186_v24 = vadd.s32 (!%p117_p2), %v185_v22, %v184_v21  ;;  %p318_p6 = scmp.ne.s32.totalorder (!%p117_p2), %s411_s2, %s317_s27  ;;  %p323_p9 = scmp.lt.u32.totalorder (!%p117_p2), %s317_s27, %s411_s2 }
   0xb   : > { %vm187_vm2 = vcmp.lt.s32.totalorder (!%p117_p2), %v186_v24, 20  ;;  %p319_p7 = pnand (!%p117_p2), %p318_p6, %p295_p5 }
   0xd   : > { %s137_s11 = scalar_select %p136_p3, %s365_s10, 2 }
   0xe   : > { %287 = sst [smem:[#allocation2]] (%p294_p4), %s342_s20  ;;  %p320_p8 = pneg %p319_p7 }
   0xf   : > { %s275_s12 = sshll.u32 %s137_s11, 3  ;;  %s189_s21 = sld [smem:[#allocation2]] }
  0x10   : > { %s139_s15 = scalar_lea.vmem %s409_s0, %s275_s12  ;;  %s143_s18 = scalar_lea.vmem %s410_s1, %s275_s12 }
  0x11   : > { %v150_v0 = vld [vmem:[%s139_s15] sm:$0xff]  ;;  %p325_p10 = pnand %p323_p9, %p320_p8 }
  0x12   : > { %v153_v1 = vsel %vm152_vm0, %v150_v0, -inf  ;;  %v151_v3 = vld [vmem:[%s143_s18] sm:$0xff] }
  0x13   : > { %154 = vmax.xlane.f32.xlu0 %v153_v1  ;;  %168 = vperm.xlu1 %309, %v151_v3  }
  0x92   : > { %v169_v12 = vpop.permute.xlu1 %168 }
  0x93   : > { %vm170_vm1 = vcmp.eq.s32.totalorder %v166_v11, %v169_v12 }
  0xa0   : > { %v155_v4 = vpop.xlane.xlu0 %154 }
  0xa1   : > { %v156_v5 = vsub.f32 %v150_v0, %v155_v4 }
  0xa3   : > { %v157_v6 = vmul.f32 1.442695, %v156_v5 }
  0xa5   : > { %311 = vpow2.f32 %v157_v6 }
  0xaf   : > { %v312_v7 = vpop.eup %311 }
  0xb0   : > { %v159_v8 = vsel %vm152_vm0, %v312_v7, 0.0 }
  0xb1   : > { %160 = vadd.xlane.f32.xlu0 %v159_v8 }
 0x13e   : > { %v161_v9 = vpop.xlane.xlu0 %160 }
 0x13f   : > { %313 = vlog2.f32 %v161_v9 }
 0x149   : > { %v314_v13 = vpop.eup %313 }
 0x14a   : > { %v163_v14 = vmul.f32 0.6931472, %v314_v13 }
 0x14c   : > { %v164_v15 = vsub.f32 %v156_v5, %v163_v14 }
 0x14e   : > { %v175_v16 = vsel %vm152_vm0, %v164_v15, 0.0  ;;  %v171_v17 = vsel %vm170_vm1, %v164_v15, 0.0 }
 0x14f   : > { %176 = vadd.xlane.f32.xlu1 %v175_v16  ;;  %v172_v18 = vsel %vm152_vm0, %v171_v17, 0.0 }
 0x150   : > { %173 = vadd.xlane.f32.xlu0 %v172_v18 }
 0x1dc   : > { %v177_v19 = vpop.xlane.xlu1 %176 }
 0x1dd   : > { %v178_v20 = vsub.f32 0.0, %v177_v19  ;;  %v174_v23 = vpop.xlane.xlu0 %173 }
 0x1de   : > { %v179_v25 = vsub.f32 0.0, %v174_v23 }
 0x1df   : > { %315 = vrcp.f32 %v178_v20 }
 0x1e9   : > { %v316_v26 = vpop.eup %315 }
 0x1ea   : > { %v181_v27 = vmul.f32 %v316_v26, %v179_v25 }
 0x1ec   : > { %v188_v28 = vsel %vm187_vm2, %v181_v27, 0.0 }
 0x1ed   : > { %v191_v29 = vsel %vm190_vm3, %v188_v28, 0.0 }
 0x1ee   : > { %192 = vadd.xlane.f32.xlu0 %v191_v29 }
 0x27b   : > { %v193_v30 = vpop.xlane.xlu0 %192 }
 0x27c   : > { %v194_v31 = vrot.slane %v193_v30, 4 }
 0x27e   : > { %v195_v32 = vadd.f32 %v194_v31, %v193_v30 }
 0x280   : > { %v196_v33 = vrot.slane %v195_v32, 2 }
 0x282   : > { %v197_v34 = vadd.f32 %v196_v33, %v195_v32 }
 0x284   : > { %v198_v35 = vrot.slane %v197_v34, 1 }
 0x286   : > { %v199_v36 = vadd.f32 %v198_v35, %v197_v34 }
 0x288   : > { %284 = vpush %v199_v36 }
 0x2b9   : > { %s285_s22 = spop %284 }
 0x2ba   : > { %s201_s23 = sadd.f32 %s285_s22, %s189_s21 }
 0x2bc   : > { %203 = sst [smem:[#allocation2]] %s201_s23  ;;  %s211_s24 = smul.f32 0.05, %s201_s23 }
 0x2be   : > { %289 = sst [smem:[#allocation3]] (%p295_p5), %s211_s24 }
 0x2bf   : > { %328 = shalt.err (!%p325_p10)
}
 0x2c0   : > { %s343_s4 = smov [#allocation3]  }
 0x2c1   : > { %291 = dma.smem_to_hbm (%p295_p5), %s343_s4, 16, %s411_s2, [#allocation4]  }
 0x2c2   : > { %334 = dma.done.wait (%p295_p5), [#allocation4], 16  }
 0x2c3   : > { %336 = vsyncadd (%p295_p5), [#allocation4], 4294967280 }
 0x2c4   : > { %227 = sfence }
 0x2c5 PF: > { %s13_s9 = sadd.s32 1, %s339_s9  }
 0x2c6   : > { %p10_p11 = scmp.ge.s32.totalorder %s13_s9, 5  }
 0x2c8   :  { %12 = sbr.rel (!%p10_p11) target bundleno = 1 (0x1), region = 69 }
 0x2cf   :  { %233 = vsyncpa [#allocation4], 1 }
 0x2d0   :  { %235 = vsyncpa [#allocation4 + $0x1], 1 }

</bundles_post_ra>
